<compile_context>
chip_gen: v7x
topology: tpu7x:2x2x1
jax: 0.10.0
libtpu: 0.0.40
codegen_flags: <defaults>
</compile_context>

<pallas_src>
import functools

import jax
import jax.numpy as jnp
from jax.experimental import pallas as pl
from jax.experimental.pallas import tpu as pltpu

GROUP = 16            # batch elements packed per 128-lane row (128 lanes / 8 features)
MAX_TILE_R = 4096     # rows per grid step -> 65536 batch elements / step


def _round_up(n: int, m: int) -> int:
    return ((n + m - 1) // m) * m


def ssa_kernel(x_ref, w1_ref, b1_ref, w2_ref, b2_ref, w3_ref, b3_ref, o_ref):
    # x: (TILE_R, 128) f32 -- each row holds 16 batch elements x 8 features, lane-dense.
    x = x_ref[...]

    # fc1 + ReLU : (TILE_R,128) @ blockdiag(W1^T) (128,128) -> (TILE_R,128)
    h1 = jnp.dot(x, w1_ref[...], preferred_element_type=jnp.float32) + b1_ref[...]
    h1 = jnp.maximum(h1, 0.0)

    # fc2 + ReLU
    h2 = jnp.dot(h1, w2_ref[...], preferred_element_type=jnp.float32) + b2_ref[...]
    h2 = jnp.maximum(h2, 0.0)

    # fc3 + ReLU : (TILE_R,128) @ blockdiag(W3^T) (128,48) -> (TILE_R,48) packed output
    h3 = jnp.dot(h2, w3_ref[...], preferred_element_type=jnp.float32) + b3_ref[...]
    h3 = jnp.maximum(h3, 0.0)

    o_ref[...] = h3.astype(o_ref.dtype)


@jax.jit
def ssa_forward(ss, params):
    """ss: (B, 8) float32.  params: PyTorch-layout weights w{1,2,3}: (out,in), biases (out,).

    Returns (B, 3) float32, matching the nn.Linear + ReLU stack semantics.
    """
    B = ss.shape[0]
    w1, b1 = params["w1"], params["b1"]
    w2, b2 = params["w2"], params["b2"]
    w3, b3 = params["w3"], params["b3"]

    # Pad batch only to a multiple of 128 (skip entirely when already aligned).
    B_pad = _round_up(B, 128)
    if B_pad != B:
        ss = jnp.pad(ss, ((0, B_pad - B), (0, 0)))

    # Free (contiguous) reshape: 16 batch elements per 128-lane row.
    R = B_pad // GROUP
    x_packed = ss.reshape(R, GROUP * 8)

    # Block-diagonal packed weights / tiled biases (tiny; built under jit per call).
    eye = jnp.eye(GROUP, dtype=jnp.float32)
    bd1 = jnp.kron(eye, w1.T)                  # (128, 128)
    bd2 = jnp.kron(eye, w2.T)                  # (128, 128)
    bd3 = jnp.kron(eye, w3.T)                  # (128, 48)
    b1p = jnp.tile(b1[None, :], (1, GROUP))    # (1, 128)
    b2p = jnp.tile(b2[None, :], (1, GROUP))    # (1, 128)
    b3p = jnp.tile(b3[None, :], (1, GROUP))    # (1, 48)

    # Tile so that (a) per-step HBM work amortizes pipeline overhead and
    # (b) there are >= 2 grid steps when possible (v7x megacore sharding).
    TILE_R = min(MAX_TILE_R, _round_up(-(-R // 2), 8))
    num_tiles = -(-R // TILE_R)

    def resident(arr):
        return pl.BlockSpec(arr.shape, lambda i: (0, 0))

    flops = 2 * R * (128 * 128 + 128 * 128 + 128 * 48)
    bytes_accessed = (B_pad * 8 * 4 + R * 48 * 4
                      + 4 * (2 * 128 * 128 + 128 * 48 + 2 * 128 + 48))

    out_packed = pl.pallas_call(
        ssa_kernel,
        out_shape=jax.ShapeDtypeStruct((R, 3 * GROUP), jnp.float32),
        grid=(num_tiles,),
        in_specs=[
            pl.BlockSpec((TILE_R, GROUP * 8), lambda i: (i, 0)),  # x (streamed, pipelined)
            resident(bd1), resident(b1p),                         # fc1 (VMEM-resident)
            resident(bd2), resident(b2p),                         # fc2
            resident(bd3), resident(b3p),                         # fc3
        ],
        out_specs=pl.BlockSpec((TILE_R, 3 * GROUP), lambda i: (i, 0)),
        compiler_params=pltpu.CompilerParams(
            dimension_semantics=("parallel",),
            vmem_limit_bytes=48 * 1024 * 1024),
        cost_estimate=pl.CostEstimate(
            flops=flops, bytes_accessed=bytes_accessed, transcendentals=0),
    )(x_packed, bd1, b1p, bd2, b2p, bd3, b3p)

    # Free reshape back to the module's (B, 3) contract; slice off batch padding.
    out = out_packed.reshape(B_pad, 3)
    return out[:B] if B_pad != B else out


def init_params(key):
    """Deterministic init mimicking nn.Linear's uniform(-1/sqrt(fan_in), 1/sqrt(fan_in)).
    Weights in PyTorch layout (out_features, in_features); biases 1-D (out_features,)."""
    keys = jax.random.split(key, 6)

    def linear(kw, kb, fan_in, fan_out):
        bound = 1.0 / jnp.sqrt(jnp.float32(fan_in))
        w = jax.random.uniform(kw, (fan_out, fan_in), jnp.float32, -bound, bound)
        b = jax.random.uniform(kb, (fan_out,), jnp.float32, -bound, bound)
        return w, b

    w1, b1 = linear(keys[0], keys[1], 8, 8)
    w2, b2 = linear(keys[2], keys[3], 8, 8)
    w3, b3 = linear(keys[4], keys[5], 8, 3)
    return {"w1": w1, "b1": b1, "w2": w2, "b2": b2, "w3": w3, "b3": b3}


def reference_forward(ss, params):
    h1 = jnp.maximum(ss @ params["w1"].T + params["b1"], 0.0)
    h2 = jnp.maximum(h1 @ params["w2"].T + params["b2"], 0.0)
    h3 = jnp.maximum(h2 @ params["w3"].T + params["b3"], 0.0)
    return h3


if __name__ == "__main__":
    key = jax.random.PRNGKey(0)
    k_in, k_params = jax.random.split(key)
    params = init_params(k_params)

    # 256: 128-aligned zero-copy path; 50: exercises pad-to-128 + tail slice path.
    for batch in (256, 50):
        ss = jax.random.normal(jax.random.fold_in(k_in, batch), (batch, 8), jnp.float32)
        out = jax.block_until_ready(ssa_forward(ss, params))
        ref = reference_forward(ss, params)
        assert out.shape == (batch, 3), out.shape
        assert jnp.allclose(out, ref, atol=1e-5, rtol=1e-5), f"mismatch at batch={batch}"

    print("KERNEL_OK")
</pallas_src>

<mosaic_0001>
module attributes {stable_mosaic.version = 11 : i64} {
  func.func @ssa_kernel(%arg0: i32, %arg1: memref<8x128xf32, #tpu.memory_space<vmem>>, %arg2: memref<128x128xf32, #tpu.memory_space<vmem>>, %arg3: memref<1x128xf32, #tpu.memory_space<vmem>>, %arg4: memref<128x128xf32, #tpu.memory_space<vmem>>, %arg5: memref<1x128xf32, #tpu.memory_space<vmem>>, %arg6: memref<128x48xf32, #tpu.memory_space<vmem>>, %arg7: memref<1x48xf32, #tpu.memory_space<vmem>>, %arg8: memref<8x48xf32, #tpu.memory_space<vmem>>) attributes {dimension_semantics = [#tpu.dimension_semantics<parallel>], iteration_bounds = array<i64: 2>, scalar_prefetch = 0 : i64, scratch_operands = 0 : i64, tpu.core_type = #tpu.core_type<tc>, window_params = [{transform_indices = @transform_0, window_bounds = array<i64: 8, 128>}, {pipeline_mode = #tpu.pipeline_mode<synchronous>, transform_indices = @transform_1, window_bounds = array<i64: 128, 128>}, {pipeline_mode = #tpu.pipeline_mode<synchronous>, transform_indices = @transform_2, window_bounds = array<i64: 1, 128>}, {pipeline_mode = #tpu.pipeline_mode<synchronous>, transform_indices = @transform_3, window_bounds = array<i64: 128, 128>}, {pipeline_mode = #tpu.pipeline_mode<synchronous>, transform_indices = @transform_4, window_bounds = array<i64: 1, 128>}, {pipeline_mode = #tpu.pipeline_mode<synchronous>, transform_indices = @transform_5, window_bounds = array<i64: 128, 48>}, {pipeline_mode = #tpu.pipeline_mode<synchronous>, transform_indices = @transform_6, window_bounds = array<i64: 1, 48>}, {transform_indices = @transform_7, window_bounds = array<i64: 8, 48>}]} {
    %c0 = arith.constant 0 : index
    %c0_0 = arith.constant 0 : index
    %0 = vector.load %arg1[%c0, %c0_0] : memref<8x128xf32, #tpu.memory_space<vmem>>, vector<8x128xf32>
    %c0_1 = arith.constant 0 : index
    %c0_2 = arith.constant 0 : index
    %1 = vector.load %arg2[%c0_1, %c0_2] : memref<128x128xf32, #tpu.memory_space<vmem>>, vector<128x128xf32>
    %cst = arith.constant dense<0.000000e+00> : vector<8x128xf32>
    %2 = tpu.matmul %0, %1, %cst {dimension_numbers = #tpu.dot_dimension_numbers<[1], [0], [0], [1], [0, 0, 1, 1], [], []>} : vector<8x128xf32>, vector<128x128xf32>, vector<8x128xf32> -> vector<8x128xf32>
    %c0_3 = arith.constant 0 : index
    %c0_4 = arith.constant 0 : index
    %3 = vector.load %arg3[%c0_3, %c0_4] : memref<1x128xf32, #tpu.memory_space<vmem>>, vector<1x128xf32>
    %4 = vector.broadcast %3 : vector<1x128xf32> to vector<8x128xf32>
    %5 = arith.addf %2, %4 : vector<8x128xf32>
    %cst_5 = arith.constant 0.000000e+00 : f32
    %6 = vector.broadcast %cst_5 : f32 to vector<8x128xf32>
    %7 = arith.maximumf %5, %6 : vector<8x128xf32>
    %c0_6 = arith.constant 0 : index
    %c0_7 = arith.constant 0 : index
    %8 = vector.load %arg4[%c0_6, %c0_7] : memref<128x128xf32, #tpu.memory_space<vmem>>, vector<128x128xf32>
    %cst_8 = arith.constant dense<0.000000e+00> : vector<8x128xf32>
    %9 = tpu.matmul %7, %8, %cst_8 {dimension_numbers = #tpu.dot_dimension_numbers<[1], [0], [0], [1], [0, 0, 1, 1], [], []>} : vector<8x128xf32>, vector<128x128xf32>, vector<8x128xf32> -> vector<8x128xf32>
    %c0_9 = arith.constant 0 : index
    %c0_10 = arith.constant 0 : index
    %10 = vector.load %arg5[%c0_9, %c0_10] : memref<1x128xf32, #tpu.memory_space<vmem>>, vector<1x128xf32>
    %11 = vector.broadcast %10 : vector<1x128xf32> to vector<8x128xf32>
    %12 = arith.addf %9, %11 : vector<8x128xf32>
    %cst_11 = arith.constant 0.000000e+00 : f32
    %13 = vector.broadcast %cst_11 : f32 to vector<8x128xf32>
    %14 = arith.maximumf %12, %13 : vector<8x128xf32>
    %c0_12 = arith.constant 0 : index
    %c0_13 = arith.constant 0 : index
    %15 = vector.load %arg6[%c0_12, %c0_13] : memref<128x48xf32, #tpu.memory_space<vmem>>, vector<128x48xf32>
    %cst_14 = arith.constant dense<0.000000e+00> : vector<8x48xf32>
    %16 = tpu.matmul %14, %15, %cst_14 {dimension_numbers = #tpu.dot_dimension_numbers<[1], [0], [0], [1], [0, 0, 1, 1], [], []>} : vector<8x128xf32>, vector<128x48xf32>, vector<8x48xf32> -> vector<8x48xf32>
    %c0_15 = arith.constant 0 : index
    %c0_16 = arith.constant 0 : index
    %17 = vector.load %arg7[%c0_15, %c0_16] : memref<1x48xf32, #tpu.memory_space<vmem>>, vector<1x48xf32>
    %18 = vector.broadcast %17 : vector<1x48xf32> to vector<8x48xf32>
    %19 = arith.addf %16, %18 : vector<8x48xf32>
    %cst_17 = arith.constant 0.000000e+00 : f32
    %20 = vector.broadcast %cst_17 : f32 to vector<8x48xf32>
    %21 = arith.maximumf %19, %20 : vector<8x48xf32>
    %c0_18 = arith.constant 0 : index
    %c0_19 = arith.constant 0 : index
    %22 = vector.load %arg8[%c0_18, %c0_19] : memref<8x48xf32, #tpu.memory_space<vmem>>, vector<8x48xf32>
    tpu.vector_store %arg8[%c0_18, %c0_19], %21 {strides = array<i32>} : memref<8x48xf32, #tpu.memory_space<vmem>>, vector<8x48xf32>,
    return
  }
  func.func @transform_0(%arg0: i32) -> (i32, i32) {
    %c0_i32 = arith.constant 0 : i32
    %c0_i32_0 = arith.constant 0 : i32
    return %arg0, %c0_i32 : i32, i32
  }
  func.func @transform_1(%arg0: i32) -> (i32, i32) {
    %c0_i32 = arith.constant 0 : i32
    %c0_i32_0 = arith.constant 0 : i32
    %c0_i32_1 = arith.constant 0 : i32
    return %c0_i32, %c0_i32_0 : i32, i32
  }
  func.func @transform_2(%arg0: i32) -> (i32, i32) {
    %c0_i32 = arith.constant 0 : i32
    %c0_i32_0 = arith.constant 0 : i32
    %c0_i32_1 = arith.constant 0 : i32
    return %c0_i32, %c0_i32_0 : i32, i32
  }
  func.func @transform_3(%arg0: i32) -> (i32, i32) {
    %c0_i32 = arith.constant 0 : i32
    %c0_i32_0 = arith.constant 0 : i32
    %c0_i32_1 = arith.constant 0 : i32
    return %c0_i32, %c0_i32_0 : i32, i32
  }
  func.func @transform_4(%arg0: i32) -> (i32, i32) {
    %c0_i32 = arith.constant 0 : i32
    %c0_i32_0 = arith.constant 0 : i32
    %c0_i32_1 = arith.constant 0 : i32
    return %c0_i32, %c0_i32_0 : i32, i32
  }
  func.func @transform_5(%arg0: i32) -> (i32, i32) {
    %c0_i32 = arith.constant 0 : i32
    %c0_i32_0 = arith.constant 0 : i32
    %c0_i32_1 = arith.constant 0 : i32
    return %c0_i32, %c0_i32_0 : i32, i32
  }
  func.func @transform_6(%arg0: i32) -> (i32, i32) {
    %c0_i32 = arith.constant 0 : i32
    %c0_i32_0 = arith.constant 0 : i32
    %c0_i32_1 = arith.constant 0 : i32
    return %c0_i32, %c0_i32_0 : i32, i32
  }
  func.func @transform_7(%arg0: i32) -> (i32, i32) {
    %c0_i32 = arith.constant 0 : i32
    %c0_i32_0 = arith.constant 0 : i32
    return %arg0, %c0_i32 : i32, i32
  }
}

</mosaic_0001>

<bundles_post_ra>
// kernel: ssa_forward.1
= control target key start
LH: loop header
LB: loop body
LE: loop exit
PB: predicated region body
PF: predicated region fallthrough
CT: control target
= control target key end

     0   :  { %s914_s24 = smov 0   ;;  %s1125_s0 = inlined_call_operand.vmem [shape: f32[16,128], index: 0, kind: input, shape index: {}]   ;;  %s1126_s1 = inlined_call_operand.vmem [shape: f32[128,128], index: 1, kind: input, shape index: {}]   ;;  %s1127_s2 = inlined_call_operand.vmem [shape: f32[1,128], index: 2, kind: input, shape index: {}]   ;;  %s1128_s3 = inlined_call_operand.vmem [shape: f32[128,128], index: 3, kind: input, shape index: {}]   ;;  %s1129_s4 = inlined_call_operand.vmem [shape: f32[1,128], index: 4, kind: input, shape index: {}]   ;;  %s1130_s5 = inlined_call_operand.vmem [shape: f32[128,48], index: 5, kind: input, shape index: {}]   ;;  %s1131_s6 = inlined_call_operand.vmem [shape: f32[1,48], index: 6, kind: input, shape index: {}]   ;;  %s1132_s7 = inlined_call_operand.vmem [shape: f32[16,48], index: 7, kind: output, shape index: {}]  }
   0x1 LB: > { %s612_s25 = sadd.s32 4294967295, %s869_s24   ;;  %p616_p0 = scmp.ge.s32.totalorder %s869_s24, 1  ;;  %s869_s24 = sphi %s914_s24, %s17_s24  }
   0x2   : > { %p236_p1 = scmp.lt.s32.totalorder %s869_s24, 3 }
   0x4   : > { %p237_p2 = pnand %p616_p0, %p236_p1 }
   0x5   : > { %v275_v0 = vld [vmem:[%s1126_s1] sm:$0xff] (!%p237_p2)  ;;  %v276_v1 = vld [vmem:[%s1126_s1 + $0x8] sm:$0xff] (!%p237_p2)  ;;  %v277_v2 = vld [vmem:[%s1126_s1 + $0x10] sm:$0xff] (!%p237_p2)  ;;  %v871_v3 = vmov (!%p237_p2), 0.0|0.0   ;;  %vm872_vm0 = vmmov (!%p237_p2), 0   ;;  %v873_v6 = vmov (!%p237_p2), 0.0  }
   0x6   : > { %240 = sbr.rel (%p237_p2) target bundleno = 688 (0x2b0), region = 48  ;;  %780 = vmatprep.subr.bf16.mxu0 (!%p237_p2), %v871_v3  ;;  %v781_v4 = vpack.c.bf16 (!%p237_p2), %v276_v1, %v275_v0  ;;  %v278_v5 = vld [vmem:[%s1126_s1 + $0x18] sm:$0xff] (!%p237_p2)  ;;  %707 = vmatprep.mubr.msk.f32.mxu0 (!%p237_p2), %vm872_vm0, %v873_v6  ;;  %v279_v8 = vld [vmem:[%s1126_s1 + $0x20] sm:$0xff] (!%p237_p2)  ;;  %v280_v9 = vld [vmem:[%s1126_s1 + $0x28] sm:$0xff] (!%p237_p2)  ;;  %p266_p3 = scmp.lt.s32.totalorder (!%p237_p2), %s612_s25, 1  ;;  %vm557_vm1 = vcmask (!%p237_p2), 392192  }
   0x7   : > { %804 = vmatprep.subr.bf16.mxu1 (!%p237_p2), %v871_v3  ;;  %742 = vmatprep.mubr.msk.f32.mxu1 (!%p237_p2), %vm872_vm0, %v873_v6  ;;  %v784_v7 = vpack.c.bf16 (!%p237_p2), %v278_v5, %v277_v2  ;;  %v369_v10 = vld [vmem:[%s1128_s3] sm:$0xff] (!%p237_p2)  ;;  %v370_v11 = vld [vmem:[%s1128_s3 + $0x8] sm:$0xff] (!%p237_p2)  ;;  %v371_v13 = vld [vmem:[%s1128_s3 + $0x10] sm:$0xff] (!%p237_p2)  ;;  %v787_v15 = vpack.c.bf16 (!%p237_p2), %v280_v9, %v279_v8 }
   0x8   : > { %782 = vmatpush3.bf16.msra.mxu0 (!%p237_p2), %v781_v4  ;;  %v805_v12 = vpack.c.bf16 (!%p237_p2), %v370_v11, %v369_v10  ;;  %v372_v14 = vld [vmem:[%s1128_s3 + $0x18] sm:$0xff] (!%p237_p2)  ;;  %v281_v16 = vld [vmem:[%s1126_s1 + $0x30] sm:$0xff] (!%p237_p2)  ;;  %v373_v19 = vld [vmem:[%s1128_s3 + $0x20] sm:$0xff] (!%p237_p2) }
   0x9   : > { %783 = vmatprep.subr.bf16.mxu0 (!%p237_p2), %v871_v3  ;;  %v282_v17 = vld [vmem:[%s1126_s1 + $0x38] sm:$0xff] (!%p237_p2)  ;;  %v808_v18 = vpack.c.bf16 (!%p237_p2), %v372_v14, %v371_v13  ;;  %v374_v20 = vld [vmem:[%s1128_s3 + $0x28] sm:$0xff] (!%p237_p2)  ;;  %v283_v22 = vld [vmem:[%s1126_s1 + $0x40] sm:$0xff] (!%p237_p2) }
   0xa   : > { %806 = vmatpush3.bf16.msra.mxu1 (!%p237_p2), %v805_v12  ;;  %v790_v21 = vpack.c.bf16 (!%p237_p2), %v282_v17, %v281_v16  ;;  %v284_v23 = vld [vmem:[%s1126_s1 + $0x48] sm:$0xff] (!%p237_p2)  ;;  %v811_v24 = vpack.c.bf16 (!%p237_p2), %v374_v20, %v373_v19  ;;  %v375_v25 = vld [vmem:[%s1128_s3 + $0x30] sm:$0xff] (!%p237_p2)  ;;  %v376_v26 = vld [vmem:[%s1128_s3 + $0x38] sm:$0xff] (!%p237_p2) }
   0xb   : > { %807 = vmatprep.subr.bf16.mxu1 (!%p237_p2), %v871_v3  ;;  %v793_v27 = vpack.c.bf16 (!%p237_p2), %v284_v23, %v283_v22  ;;  %v285_v28 = vld [vmem:[%s1126_s1 + $0x50] sm:$0xff] (!%p237_p2)  ;;  %v286_v29 = vld [vmem:[%s1126_s1 + $0x58] sm:$0xff] (!%p237_p2)  ;;  %v814_v30 = vpack.c.bf16 (!%p237_p2), %v376_v26, %v375_v25  ;;  %v377_v31 = vld [vmem:[%s1128_s3 + $0x40] sm:$0xff] (!%p237_p2) }
   0xc   : > { %785 = vmatpush3.bf16.msra.mxu0 (!%p237_p2), %v784_v7  ;;  %v378_v32 = vld [vmem:[%s1128_s3 + $0x48] sm:$0xff] (!%p237_p2)  ;;  %v796_v33 = vpack.c.bf16 (!%p237_p2), %v286_v29, %v285_v28  ;;  %v287_v34 = vld [vmem:[%s1126_s1 + $0x60] sm:$0xff] (!%p237_p2)  ;;  %v379_v37 = vld [vmem:[%s1128_s3 + $0x50] sm:$0xff] (!%p237_p2) }
   0xd   : > { %786 = vmatprep.subr.bf16.mxu0 %v871_v3  ;;  %v288_v35 = vld [vmem:[%s1126_s1 + $0x68] sm:$0xff]  ;;  %v817_v36 = vpack.c.bf16 %v378_v32, %v377_v31  ;;  %s1134_s25 = smov (!%p266_p3, %s612_s25), 1  ;;  %v380_v38 = vld [vmem:[%s1128_s3 + $0x58] sm:$0xff]  ;;  %v289_v40 = vld [vmem:[%s1126_s1 + $0x70] sm:$0xff] }
   0xe   : > { %809 = vmatpush3.bf16.msra.mxu1 %v808_v18  ;;  %v799_v39 = vpack.c.bf16 %v288_v35, %v287_v34  ;;  %v290_v41 = vld [vmem:[%s1126_s1 + $0x78] sm:$0xff]  ;;  %v820_v42 = vpack.c.bf16 %v380_v38, %v379_v37  ;;  %s617_s17 = sshll.u32 %s1134_s25, 3  ;;  %v381_v43 = vld [vmem:[%s1128_s3 + $0x60] sm:$0xff]  ;;  %v382_v44 = vld [vmem:[%s1128_s3 + $0x68] sm:$0xff] }
   0xf   : > { %810 = vmatprep.subr.bf16.mxu1 %v871_v3  ;;  %v802_v45 = vpack.c.bf16 %v290_v41, %v289_v40  ;;  %s269_s26 = scalar_lea.vmem %s1125_s0, %s617_s17  ;;  %v823_v46 = vpack.c.bf16 %v382_v44, %v381_v43  ;;  %v383_v48 = vld [vmem:[%s1128_s3 + $0x70] sm:$0xff]  ;;  %v384_v49 = vld [vmem:[%s1128_s3 + $0x78] sm:$0xff]  ;;  %v463_v51 = vld [vmem:[%s1130_s5] sm:$0xff]  ;;  %s273_s8 = scalar_lea.vmem %s1132_s7, %s617_s17 }
  0x10   : > { %788 = vmatpush3.bf16.msra.mxu0 %v787_v15  ;;  %v274_v47 = vld [vmem:[%s269_s26] sm:$0xff]  ;;  %v826_v50 = vpack.c.bf16 %v384_v49, %v383_v48  ;;  %v464_v52 = vld [vmem:[%s1130_s5 + $0x8] sm:$0xff]  ;;  %v465_v53 = vld [vmem:[%s1130_s5 + $0x10] sm:$0xff] }
  0x11   : > { %789 = vmatprep.subr.bf16.mxu0 %v871_v3  ;;  %v829_v54 = vpack.c.bf16 %v464_v52, %v463_v51  ;;  %v466_v55 = vld [vmem:[%s1130_s5 + $0x18] sm:$0xff]  ;;  %v467_v57 = vld [vmem:[%s1130_s5 + $0x20] sm:$0xff]  ;;  %v468_v58 = vld [vmem:[%s1130_s5 + $0x28] sm:$0xff] }
  0x12   : > { %812 = vmatpush3.bf16.msra.mxu1 %v811_v24  ;;  %v832_v56 = vpack.c.bf16 %v466_v55, %v465_v53  ;;  %v835_v59 = vpack.c.bf16 %v468_v58, %v467_v57  ;;  %v469_v60 = vld [vmem:[%s1130_s5 + $0x30] sm:$0xff]  ;;  %v470_v61 = vld [vmem:[%s1130_s5 + $0x38] sm:$0xff]  ;;  %v471_v63 = vld [vmem:[%s1130_s5 + $0x40] sm:$0xff] }
  0x13   : > { %813 = vmatprep.subr.bf16.mxu1 %v871_v3  ;;  %v838_v62 = vpack.c.bf16 %v470_v61, %v469_v60  ;;  %v472_v0 = vld [vmem:[%s1130_s5 + $0x48] sm:$0xff]  ;;  %v473_v2 = vld [vmem:[%s1130_s5 + $0x50] sm:$0xff]  ;;  %v474_v4 = vld [vmem:[%s1130_s5 + $0x58] sm:$0xff] }
  0x14   : > { %791 = vmatpush3.bf16.msra.mxu0 %v790_v21  ;;  %v841_v1 = vpack.c.bf16 %v472_v0, %v471_v63  ;;  %v844_v5 = vpack.c.bf16 %v474_v4, %v473_v2  ;;  %v476_v7 = vld [vmem:[%s1130_s5 + $0x68] sm:$0xff]  ;;  %v619_v9 = vld [vmem:[%s1127_s2] ss:$0 sm:$0xff]  ;;  %v477_v14 = vld [vmem:[%s1130_s5 + $0x70] sm:$0xff] }
  0x15   : > { %792 = vmatprep.subr.bf16.mxu0 %v871_v3  ;;  %v478_v15 = vld [vmem:[%s1130_s5 + $0x78] sm:$0xff]  ;;  %v621_v21 = vld [vmem:[%s1131_s6] ss:$0 sm:$0xff] }
  0x16   : > { %815 = vmatpush3.bf16.msra.mxu1 %v814_v30  ;;  %v850_v16 = vpack.c.bf16 %v478_v15, %v477_v14 }
  0x17   : > { %816 = vmatprep.subr.bf16.mxu1 %v871_v3 }
  0x18   : > { %794 = vmatpush3.bf16.msra.mxu0 %v793_v27 }
  0x19   : > { %795 = vmatprep.subr.bf16.mxu0 %v871_v3 }
  0x1a   : > { %818 = vmatpush3.bf16.msra.mxu1 %v817_v36 }
  0x1b   : > { %819 = vmatprep.subr.bf16.mxu1 %v871_v3 }
  0x1c   : > { %797 = vmatpush3.bf16.msra.mxu0 %v796_v33 }
  0x1d   : > { %798 = vmatprep.subr.bf16.mxu0 %v871_v3 }
  0x1e   : > { %821 = vmatpush3.bf16.msra.mxu1 %v820_v42 }
  0x1f   : > { %822 = vmatprep.subr.bf16.mxu1 %v871_v3 }
  0x20   : > { %800 = vmatpush3.bf16.msra.mxu0 %v799_v39 }
  0x21   : > { %801 = vmatprep.subr.bf16.mxu0 %v871_v3 }
  0x22   : > { %824 = vmatpush3.bf16.msra.mxu1 %v823_v46 }
  0x23   : > { %825 = vmatprep.subr.bf16.mxu1 %v871_v3 }
  0x24   : > { %803 = vmatpush3.bf16.msra.mxu0 %v802_v45 }
  0x25   : > { %828 = vmatprep.subr.bf16.mxu0 %v871_v3 }
  0x26   : > { %827 = vmatpush3.bf16.msra.mxu1 %v826_v50 }
  0x27   : > { %708 = vmatmul.mubr.f32.vlgmr.msra.gmra.mrb[0].mxu0 %v274_v47 }
  0x28   : > { %777 = vmatprep.mubr.msk.f32.mxu0 %vm872_vm0, %v873_v6  ;;  %830 = vmatpush3.bf16.msra.mxu0 %v829_v54  ;;  %v475_v6 = vld [vmem:[%s1130_s5 + $0x60] sm:$0xff] }
  0x29   : > { %831 = vmatprep.subr.bf16.mxu0 %v871_v3  ;;  %v847_v8 = vpack.c.bf16 %v476_v7, %v475_v6 }
  0x2c   : > { %833 = vmatpush3.bf16.msra.mxu0 %v832_v56 }
  0x2d   : > { %834 = vmatprep.subr.bf16.mxu0 %v871_v3 }
  0x30   : > { %836 = vmatpush3.bf16.msra.mxu0 %v835_v59 }
  0x31   : > { %837 = vmatprep.subr.bf16.mxu0 %v871_v3 }
  0x34   : > { %839 = vmatpush3.bf16.msra.mxu0 %v838_v62 }
  0x35   : > { %840 = vmatprep.subr.bf16.mxu0 %v871_v3 }
  0x38   : > { %842 = vmatpush3.bf16.msra.mxu0 %v841_v1 }
  0x39   : > { %843 = vmatprep.subr.bf16.mxu0 %v871_v3 }
  0x3c   : > { %845 = vmatpush3.bf16.msra.mxu0 %v844_v5 }
  0x3d   : > { %846 = vmatprep.subr.bf16.mxu0 %v871_v3 }
  0x40   : > { %848 = vmatpush3.bf16.msra.mxu0 %v847_v8 }
  0x41   : > { %849 = vmatprep.subr.bf16.mxu0 %v871_v3  ;;  %v620_v3 = vld [vmem:[%s1129_s4] ss:$0 sm:$0xff] }
  0x44   : > { %851 = vmatpush3.bf16.msra.mxu0 %v850_v16 }
  0xfa   : > { %v364_v10 = vpop.f32.mrb[0].mxu0 }
  0xfb   : > { %v365_v11 = vadd.f32 %v619_v9, %v364_v10  ;;  %v709_v12 = vpop.f32.mrb[1].mxu0 }
  0xfd   : > { %v368_v13 = vmax.f32 %v365_v11, 0.0 }
  0xff   : > { %743 = vmatmul.mubr.f32.vlgmr.msra.gmra.mrb[0].mxu1 %v368_v13 }
 0x1d2   : > { %v458_v17 = vpop.f32.mrb[0].mxu1 }
 0x1d3   : > { %v459_v18 = vadd.f32 %v620_v3, %v458_v17  ;;  %v744_v19 = vpop.f32.mrb[1].mxu1 }
 0x1d5   : > { %v462_v20 = vmax.f32 %v459_v18, 0.0 }
 0x1d7   : > { %778 = vmatmul.mubr.f32.vlgmr.msra.gmra.mrb[2].mxu0 %v462_v20 }
 0x2aa   : > { %v552_v22 = vpop.f32.mrb[2].mxu0 }
 0x2ab   : > { %v553_v23 = vadd.f32 %v621_v21, %v552_v22  ;;  %v779_v24 = vpop.f32.mrb[3].mxu0 }
 0x2ad   : > { %v556_v25 = vmax.f32 %v553_v23, 0.0 }
 0x2af   : > { %558 = vst.msk [vmem:[%s273_s8] sm:$0xff] %vm557_vm1, %v556_v25 }
 0x2b0 PF: > { %s17_s24 = sadd.s32 1, %s869_s24  }
 0x2b1   : > { %p14_p4 = scmp.ge.s32.totalorder %s17_s24, 4  }
 0x2b3   :  { %16 = sbr.rel (!%p14_p4) target bundleno = 1 (0x1), region = 78 }

</bundles_post_ra>
